<compile_context>
chip_gen: v7x
topology: tpu7x:2x2x1
jax: 0.10.0
libtpu: 0.0.40
codegen_flags: <defaults>
</compile_context>

<pallas_src>
import functools

import jax
import jax.numpy as jnp
from jax.experimental import pallas as pl
from jax.experimental.pallas import tpu as pltpu
import numpy as np


def _round_up(x, m):
    return (x + m - 1) // m * m


def _miou_counts_kernel(pred_ref, mask_ref, inter_ref, mcnt_ref, pcnt_ref, *,
                        num_classes, ignore_labels, hw, tile_p, acc_w,
                        n_strips, unroll):
    c = num_classes
    pi = pl.program_id(1)
    base = pi * tile_p                      # first pixel index of this block

    # Hoisted constants (JAX does not CSE broadcasts inside the loop).
    cls_idx = jax.lax.broadcasted_iota(jnp.int32, (c, acc_w), 0)   # (C, W)
    lane_idx = jax.lax.broadcasted_iota(jnp.int32, (1, acc_w), 1)  # (1, W)

    def strip(s, carry):
        acc_i, acc_m, acc_p = carry
        off = pl.multiple_of(s * acc_w, acc_w)
        pred_s = pred_ref[:, pl.ds(off, acc_w)]     # (C, W) native dtype
        mask_s = mask_ref[:, pl.ds(off, acc_w)]     # (1, W) int32

        # argmax over classes (sublane axis); first occurrence on ties,
        # matching torch.argmax.
        mx = jnp.max(pred_s, axis=0, keepdims=True)
        pred_cls = jnp.min(jnp.where(pred_s == mx, cls_idx, c),
                           axis=0, keepdims=True)    # (1, W) int32

        # validity: inside the image (kills garbage partial-block tail lanes)
        # and not an ignore label.
        valid = lane_idx < (hw - base - s * acc_w)
        for ig in ignore_labels:
            valid = valid & (mask_s != ig)

        # Fold validity into the (1, W) operands; C is never a real class so
        # invalid lanes drop out of every one-hot below.
        mask_f = jnp.where(valid, mask_s, c)
        pred_f = jnp.where(valid, pred_cls, c)

        m_oh = mask_f == cls_idx                     # (C, W) bool
        p_oh = pred_f == cls_idx                     # (C, W) bool
        agree = pred_f == mask_f                     # (1, W) bool
        i_oh = m_oh & agree                          # (C, W) bool

        return (acc_i + i_oh.astype(jnp.int32),
                acc_m + m_oh.astype(jnp.int32),
                acc_p + p_oh.astype(jnp.int32))

    zeros = jnp.zeros((c, acc_w), jnp.int32)
    acc_i, acc_m, acc_p = jax.lax.fori_loop(
        0, n_strips, strip, (zeros, zeros, zeros), unroll=unroll)

    # Touch the resident VMEM accumulators once per grid step.
    @pl.when(pi == 0)
    def _():
        inter_ref[...] = acc_i
        mcnt_ref[...] = acc_m
        pcnt_ref[...] = acc_p

    @pl.when(pi > 0)
    def _():
        inter_ref[...] += acc_i
        mcnt_ref[...] += acc_m
        pcnt_ref[...] += acc_p


def _plan(hw, c, dtype_bytes, tile_p=None):
    """Pick (tile_p, acc_w, n_strips, unroll, vmem_limit_bytes)."""
    # Strip width: keep the 3 carried (c, acc_w) int32 accumulators in a
    # modest number of vregs (3 * ceil(c/8) * acc_w/128), strip >= 128 lanes.
    c8 = (c + 7) // 8
    if c8 <= 1:
        acc_w = 512
    elif c8 <= 3:
        acc_w = 256
    else:
        acc_w = 128

    # Generation-aware VMEM budget (v7x has half the VMEM of v5e/v6e).
    try:
        vmem_cap = int(getattr(pltpu.get_tpu_info(), "vmem_capacity_bytes",
                               64 << 20))
    except Exception:  # pragma: no cover - conservative fallback
        vmem_cap = 64 << 20
    budget = min(20 << 20, vmem_cap // 3)

    # Honest VMEM estimate: sublane padding of pred (dtype-dependent) and of
    # the (1, tp) int32 mask tile (pads to 8 sublanes), double-buffered
    # inputs, double-buffered resident outputs.
    sub = max(8, 8 * (4 // max(1, dtype_bytes)))
    c_pad_pred = _round_up(c, sub)
    c_pad_i32 = _round_up(c, 8)

    def vmem_est(tp):
        pred_buf = c_pad_pred * tp * dtype_bytes
        mask_buf = 8 * tp * 4
        out_buf = 3 * c_pad_i32 * acc_w * 4
        return 2 * (pred_buf + mask_buf) + 2 * out_buf

    if tile_p is None:
        # ~1 MiB of raw prediction per block to amortize per-step overhead.
        n_strips = max(1, (1 << 20) // max(1, c * dtype_bytes * acc_w))
    else:
        n_strips = max(1, tile_p // acc_w)
    n_strips = min(n_strips, max(1, -(-hw // acc_w)))       # don't exceed hw
    n_strips = min(128, 1 << (n_strips.bit_length() - 1))   # power of two
    while n_strips > 1 and vmem_est(n_strips * acc_w) > budget:
        n_strips //= 2

    tp = n_strips * acc_w
    unroll = True if n_strips <= 4 else 4
    vmem_limit = int(min(max(2 * vmem_est(tp), 16 << 20), 32 << 20, vmem_cap))
    return tp, acc_w, n_strips, unroll, vmem_limit


def mean_iou(prediction, mask, ignore_labels=None, tile_p=None):
    """prediction: [b, c, h, w] float; mask: [b, h, w] int.

    Returns (iou_per_class, miou). iou_per_class has fixed length C with IoU
    for classes present in the (filtered) mask and NaN for absent ones.
    # TODO(synk): PyTorch returns a variable-length python list over
    # torch.unique(pure_mask); JAX needs static shapes, so absent classes are
    # NaN-marked and miou averages only the present ones (same value). Mask
    # labels outside [0, C) that are not ignore labels cannot get their own
    # IoU entry here (the reference would create one via torch.unique).
    """
    b, c, h, w = prediction.shape
    hw = h * w
    dtype_bytes = jnp.dtype(prediction.dtype).itemsize

    tp, acc_w, n_strips, unroll, vmem_limit = _plan(hw, c, dtype_bytes, tile_p)

    # Pure metadata reshapes; prediction keeps its native dtype and NCHW
    # pixel-contiguous order (no HBM transpose, no astype copy, no jnp.pad).
    pred3d = prediction.reshape(b, c, hw)
    mask3d = mask.reshape(b, 1, hw).astype(jnp.int32)

    ig = tuple(int(x) for x in ignore_labels) if ignore_labels is not None else ()
    kernel = functools.partial(
        _miou_counts_kernel, num_classes=c, ignore_labels=ig, hw=hw,
        tile_p=tp, acc_w=acc_w, n_strips=n_strips, unroll=unroll)

    grid = (b, pl.cdiv(hw, tp))
    cost = pl.CostEstimate(
        flops=int(10 * b * c * hw),
        transcendentals=0,
        bytes_accessed=int(b * c * hw * dtype_bytes + b * hw * 4
                           + 3 * b * c * acc_w * 4))

    inter_o, mcnt_o, pcnt_o = pl.pallas_call(
        kernel,
        out_shape=[jax.ShapeDtypeStruct((b, c, acc_w), jnp.int32)] * 3,
        grid_spec=pltpu.PrefetchScalarGridSpec(
            num_scalar_prefetch=0,
            grid=grid,
            in_specs=[
                pl.BlockSpec((None, c, tp), lambda bi, pi: (bi, 0, pi)),
                pl.BlockSpec((None, 1, tp), lambda bi, pi: (bi, 0, pi)),
            ],
            out_specs=[pl.BlockSpec((None, c, acc_w),
                                    lambda bi, pi: (bi, 0, 0))] * 3,
        ),
        compiler_params=pltpu.CompilerParams(
            dimension_semantics=("parallel", "arbitrary"),
            vmem_limit_bytes=vmem_limit),
        cost_estimate=cost,
    )(pred3d, mask3d)

    # Single cross-lane / cross-batch reduction, done once in glue.
    inter = jnp.sum(inter_o, axis=(0, 2)).astype(jnp.float32)
    mcnt = jnp.sum(mcnt_o, axis=(0, 2)).astype(jnp.float32)
    pcnt = jnp.sum(pcnt_o, axis=(0, 2)).astype(jnp.float32)

    present = mcnt > 0                      # labels = torch.unique(pure_mask)
    union = mcnt + pcnt - inter
    iou = jnp.where(present, inter / jnp.where(present, union, 1.0), jnp.nan)
    # TODO(synk): if every pixel is ignored the PyTorch reference raises
    # (division by zero); here miou becomes NaN instead.
    miou = (jnp.sum(jnp.where(present, iou, 0.0))
            / jnp.sum(present.astype(jnp.float32)))
    return iou, miou


def _ref_mean_iou(prediction, mask, ignore_labels):
    """NumPy reference mirroring the PyTorch module exactly."""
    pred = np.argmax(np.asarray(prediction), axis=1)
    m = np.asarray(mask).reshape(-1)
    p = pred.reshape(-1)
    if ignore_labels is not None:
        keep = np.ones_like(m, dtype=bool)
        for ig in ignore_labels:
            keep &= (m != ig)
        m, p = m[keep], p[keep]
    labels = np.unique(m)
    iou_list = []
    for lab in labels:
        inter = int(np.sum((m == lab) & (p == lab)))
        union = int(np.sum(m == lab)) + int(np.sum(p == lab)) - inter
        iou_list.append(inter / union)
    return labels, iou_list, sum(iou_list) / len(iou_list)


if __name__ == "__main__":
    b, c, h, w = 2, 4, 16, 16
    ignore_labels = [255]

    key = jax.random.PRNGKey(0)
    kp, km, ki = jax.random.split(key, 3)
    prediction = jax.random.normal(kp, (b, c, h, w), dtype=jnp.float32)
    mask = jax.random.randint(km, (b, h, w), 0, c, dtype=jnp.int32)
    # sprinkle some ignore-label pixels
    ignore_pix = jax.random.bernoulli(ki, 0.1, (b, h, w))
    mask = jnp.where(ignore_pix, jnp.int32(255), mask)

    iou, miou = mean_iou(prediction, mask, ignore_labels=ignore_labels)
    iou = jax.block_until_ready(iou)
    miou = jax.block_until_ready(miou)

    # sanity check against the NumPy reference of the PyTorch semantics
    labels, ref_iou_list, ref_miou = _ref_mean_iou(prediction, mask, ignore_labels)
    got_iou_present = np.asarray(iou)[labels]
    np.testing.assert_allclose(got_iou_present, np.array(ref_iou_list),
                               rtol=1e-6, atol=1e-6)
    np.testing.assert_allclose(float(miou), ref_miou, rtol=1e-6, atol=1e-6)

    print("KERNEL_OK")
</pallas_src>

<mosaic_0001>
module attributes {stable_mosaic.version = 11 : i64} {
  func.func @_miou_counts_kernel(%arg0: i32, %arg1: i32, %arg2: memref<1x4x512xf32, #tpu.memory_space<vmem>>, %arg3: memref<1x1x512xi32, #tpu.memory_space<vmem>>, %arg4: memref<1x4x512xi32, #tpu.memory_space<vmem>>, %arg5: memref<1x4x512xi32, #tpu.memory_space<vmem>>, %arg6: memref<1x4x512xi32, #tpu.memory_space<vmem>>) attributes {dimension_semantics = [#tpu.dimension_semantics<parallel>, #tpu.dimension_semantics<arbitrary>], iteration_bounds = array<i64: 2, 1>, scalar_prefetch = 0 : i64, scratch_operands = 0 : i64, tpu.core_type = #tpu.core_type<tc>, window_params = [{transform_indices = @transform_0, window_bounds = array<i64: 1, 4, 512>}, {transform_indices = @transform_1, window_bounds = array<i64: 1, 1, 512>}, {transform_indices = @transform_2, window_bounds = array<i64: 1, 4, 512>}, {transform_indices = @transform_3, window_bounds = array<i64: 1, 4, 512>}, {transform_indices = @transform_4, window_bounds = array<i64: 1, 4, 512>}]} {
    %c512_i32 = arith.constant 512 : i32
    %0 = arith.muli %arg1, %c512_i32 : i32
    %1 = tpu.iota {dimensions = array<i32: 0>} : vector<4x512xi32>
    %2 = tpu.iota {dimensions = array<i32: 1>} : vector<1x512xi32>
    %c0_i32 = arith.constant 0 : i32
    %3 = vector.broadcast %c0_i32 : i32 to vector<4x512xi32>
    %c0_i32_0 = arith.constant 0 : i32
    %c512_i32_1 = arith.constant 512 : i32
    %4 = arith.muli %c0_i32_0, %c512_i32_1 : i32
    %5 = tpu.assume_multiple %4, 512 : i32
    %c0 = arith.constant 0 : index
    %c0_2 = arith.constant 0 : index
    %6 = arith.index_cast %5 : i32 to index
    %7 = vector.load %arg2[%c0, %c0_2, %6] : memref<1x4x512xf32, #tpu.memory_space<vmem>>, vector<1x4x512xf32>
    %8 = vector.shape_cast %7 : vector<1x4x512xf32> to vector<4x512xf32>
    %c0_3 = arith.constant 0 : index
    %c0_4 = arith.constant 0 : index
    %9 = arith.index_cast %5 : i32 to index
    %10 = vector.load %arg3[%c0_3, %c0_4, %9] : memref<1x1x512xi32, #tpu.memory_space<vmem>>, vector<1x1x512xi32>
    %11 = vector.shape_cast %10 : vector<1x1x512xi32> to vector<1x512xi32>
    %cst = arith.constant dense<0xFF800000> : vector<512xf32>
    %12 = vector.multi_reduction <maximumf>, %8, %cst [0] : vector<4x512xf32> to vector<512xf32>
    %13 = vector.shape_cast %12 : vector<512xf32> to vector<1x512xf32>
    %14 = vector.broadcast %13 : vector<1x512xf32> to vector<4x512xf32>
    %15 = arith.cmpf oeq, %8, %14 : vector<4x512xf32>
    %c4_i32 = arith.constant 4 : i32
    %16 = vector.broadcast %c4_i32 : i32 to vector<4x512xi32>
    %17 = arith.select %15, %1, %16 : vector<4x512xi1>, vector<4x512xi32>
    %cst_5 = arith.constant dense<2147483647> : vector<512xi32>
    %18 = vector.multi_reduction <minsi>, %17, %cst_5 [0] : vector<4x512xi32> to vector<512xi32>
    %19 = vector.shape_cast %18 : vector<512xi32> to vector<1x512xi32>
    %c256_i32 = arith.constant 256 : i32
    %20 = arith.subi %c256_i32, %0 : i32
    %c512_i32_6 = arith.constant 512 : i32
    %21 = arith.muli %c0_i32_0, %c512_i32_6 : i32
    %22 = arith.subi %20, %21 : i32
    %23 = vector.broadcast %22 : i32 to vector<1x512xi32>
    %24 = arith.cmpi slt, %2, %23 : vector<1x512xi32>
    %c255_i32 = arith.constant 255 : i32
    %25 = vector.broadcast %c255_i32 : i32 to vector<1x512xi32>
    %26 = arith.cmpi ne, %11, %25 : vector<1x512xi32>
    %27 = arith.andi %24, %26 : vector<1x512xi1>
    %c4_i32_7 = arith.constant 4 : i32
    %28 = vector.broadcast %c4_i32_7 : i32 to vector<1x512xi32>
    %29 = arith.select %27, %11, %28 : vector<1x512xi1>, vector<1x512xi32>
    %c4_i32_8 = arith.constant 4 : i32
    %30 = vector.broadcast %c4_i32_8 : i32 to vector<1x512xi32>
    %31 = arith.select %27, %19, %30 : vector<1x512xi1>, vector<1x512xi32>
    %32 = vector.broadcast %29 : vector<1x512xi32> to vector<4x512xi32>
    %33 = arith.cmpi eq, %32, %1 : vector<4x512xi32>
    %34 = vector.broadcast %31 : vector<1x512xi32> to vector<4x512xi32>
    %35 = arith.cmpi eq, %34, %1 : vector<4x512xi32>
    %36 = arith.cmpi eq, %31, %29 : vector<1x512xi32>
    %37 = vector.broadcast %36 : vector<1x512xi1> to vector<4x512xi1>
    %38 = arith.andi %33, %37 : vector<4x512xi1>
    %39 = arith.extui %38 : vector<4x512xi1> to vector<4x512xi32>
    %40 = arith.addi %3, %39 : vector<4x512xi32>
    %41 = arith.extui %33 : vector<4x512xi1> to vector<4x512xi32>
    %42 = arith.addi %3, %41 : vector<4x512xi32>
    %43 = arith.extui %35 : vector<4x512xi1> to vector<4x512xi32>
    %44 = arith.addi %3, %43 : vector<4x512xi32>
    %c1_i32 = arith.constant 1 : i32
    %c0_i32_9 = arith.constant 0 : i32
    %45 = arith.cmpi eq, %arg1, %c0_i32_9 : i32
    %46 = arith.extui %45 : i1 to i32
    %c0_i32_10 = arith.constant 0 : i32
    %47 = arith.cmpi ne, %46, %c0_i32_10 : i32
    scf.if %47 {
      %c0_13 = arith.constant 0 : index
      %c0_14 = arith.constant 0 : index
      %c0_15 = arith.constant 0 : index
      %51 = vector.load %arg4[%c0_13, %c0_14, %c0_15] : memref<1x4x512xi32, #tpu.memory_space<vmem>>, vector<1x4x512xi32>
      %52 = vector.shape_cast %51 : vector<1x4x512xi32> to vector<4x512xi32>
      %53 = vector.shape_cast %40 : vector<4x512xi32> to vector<1x4x512xi32>
      tpu.vector_store %arg4[%c0_13, %c0_14, %c0_15], %53 {strides = array<i32>} : memref<1x4x512xi32, #tpu.memory_space<vmem>>, vector<1x4x512xi32>,
      %c0_16 = arith.constant 0 : index
      %c0_17 = arith.constant 0 : index
      %c0_18 = arith.constant 0 : index
      %54 = vector.load %arg5[%c0_16, %c0_17, %c0_18] : memref<1x4x512xi32, #tpu.memory_space<vmem>>, vector<1x4x512xi32>
      %55 = vector.shape_cast %54 : vector<1x4x512xi32> to vector<4x512xi32>
      %56 = vector.shape_cast %42 : vector<4x512xi32> to vector<1x4x512xi32>
      tpu.vector_store %arg5[%c0_16, %c0_17, %c0_18], %56 {strides = array<i32>} : memref<1x4x512xi32, #tpu.memory_space<vmem>>, vector<1x4x512xi32>,
      %c0_19 = arith.constant 0 : index
      %c0_20 = arith.constant 0 : index
      %c0_21 = arith.constant 0 : index
      %57 = vector.load %arg6[%c0_19, %c0_20, %c0_21] : memref<1x4x512xi32, #tpu.memory_space<vmem>>, vector<1x4x512xi32>
      %58 = vector.shape_cast %57 : vector<1x4x512xi32> to vector<4x512xi32>
      %59 = vector.shape_cast %44 : vector<4x512xi32> to vector<1x4x512xi32>
      tpu.vector_store %arg6[%c0_19, %c0_20, %c0_21], %59 {strides = array<i32>} : memref<1x4x512xi32, #tpu.memory_space<vmem>>, vector<1x4x512xi32>,
    } else {
    }
    %c0_i32_11 = arith.constant 0 : i32
    %48 = arith.cmpi sgt, %arg1, %c0_i32_11 : i32
    %49 = arith.extui %48 : i1 to i32
    %c0_i32_12 = arith.constant 0 : i32
    %50 = arith.cmpi ne, %49, %c0_i32_12 : i32
    scf.if %50 {
      %c0_13 = arith.constant 0 : index
      %c0_14 = arith.constant 0 : index
      %c0_15 = arith.constant 0 : index
      %51 = vector.load %arg4[%c0_13, %c0_14, %c0_15] : memref<1x4x512xi32, #tpu.memory_space<vmem>>, vector<1x4x512xi32>
      %52 = vector.shape_cast %51 : vector<1x4x512xi32> to vector<4x512xi32>
      %53 = arith.addi %52, %40 : vector<4x512xi32>
      %c0_16 = arith.constant 0 : index
      %c0_17 = arith.constant 0 : index
      %c0_18 = arith.constant 0 : index
      %54 = vector.load %arg4[%c0_16, %c0_17, %c0_18] : memref<1x4x512xi32, #tpu.memory_space<vmem>>, vector<1x4x512xi32>
      %55 = vector.shape_cast %54 : vector<1x4x512xi32> to vector<4x512xi32>
      %56 = vector.shape_cast %53 : vector<4x512xi32> to vector<1x4x512xi32>
      tpu.vector_store %arg4[%c0_16, %c0_17, %c0_18], %56 {strides = array<i32>} : memref<1x4x512xi32, #tpu.memory_space<vmem>>, vector<1x4x512xi32>,
      %c0_19 = arith.constant 0 : index
      %c0_20 = arith.constant 0 : index
      %c0_21 = arith.constant 0 : index
      %57 = vector.load %arg5[%c0_19, %c0_20, %c0_21] : memref<1x4x512xi32, #tpu.memory_space<vmem>>, vector<1x4x512xi32>
      %58 = vector.shape_cast %57 : vector<1x4x512xi32> to vector<4x512xi32>
      %59 = arith.addi %58, %42 : vector<4x512xi32>
      %c0_22 = arith.constant 0 : index
      %c0_23 = arith.constant 0 : index
      %c0_24 = arith.constant 0 : index
      %60 = vector.load %arg5[%c0_22, %c0_23, %c0_24] : memref<1x4x512xi32, #tpu.memory_space<vmem>>, vector<1x4x512xi32>
      %61 = vector.shape_cast %60 : vector<1x4x512xi32> to vector<4x512xi32>
      %62 = vector.shape_cast %59 : vector<4x512xi32> to vector<1x4x512xi32>
      tpu.vector_store %arg5[%c0_22, %c0_23, %c0_24], %62 {strides = array<i32>} : memref<1x4x512xi32, #tpu.memory_space<vmem>>, vector<1x4x512xi32>,
      %c0_25 = arith.constant 0 : index
      %c0_26 = arith.constant 0 : index
      %c0_27 = arith.constant 0 : index
      %63 = vector.load %arg6[%c0_25, %c0_26, %c0_27] : memref<1x4x512xi32, #tpu.memory_space<vmem>>, vector<1x4x512xi32>
      %64 = vector.shape_cast %63 : vector<1x4x512xi32> to vector<4x512xi32>
      %65 = arith.addi %64, %44 : vector<4x512xi32>
      %c0_28 = arith.constant 0 : index
      %c0_29 = arith.constant 0 : index
      %c0_30 = arith.constant 0 : index
      %66 = vector.load %arg6[%c0_28, %c0_29, %c0_30] : memref<1x4x512xi32, #tpu.memory_space<vmem>>, vector<1x4x512xi32>
      %67 = vector.shape_cast %66 : vector<1x4x512xi32> to vector<4x512xi32>
      %68 = vector.shape_cast %65 : vector<4x512xi32> to vector<1x4x512xi32>
      tpu.vector_store %arg6[%c0_28, %c0_29, %c0_30], %68 {strides = array<i32>} : memref<1x4x512xi32, #tpu.memory_space<vmem>>, vector<1x4x512xi32>,
    } else {
    }
    return
  }
  func.func @transform_0(%arg0: i32, %arg1: i32) -> (i32, i32, i32) {
    %c0_i32 = arith.constant 0 : i32
    %c0_i32_0 = arith.constant 0 : i32
    return %arg0, %c0_i32, %arg1 : i32, i32, i32
  }
  func.func @transform_1(%arg0: i32, %arg1: i32) -> (i32, i32, i32) {
    %c0_i32 = arith.constant 0 : i32
    %c0_i32_0 = arith.constant 0 : i32
    return %arg0, %c0_i32, %arg1 : i32, i32, i32
  }
  func.func @transform_2(%arg0: i32, %arg1: i32) -> (i32, i32, i32) {
    %c0_i32 = arith.constant 0 : i32
    %c0_i32_0 = arith.constant 0 : i32
    %c0_i32_1 = arith.constant 0 : i32
    return %arg0, %c0_i32, %c0_i32_0 : i32, i32, i32
  }
  func.func @transform_3(%arg0: i32, %arg1: i32) -> (i32, i32, i32) {
    %c0_i32 = arith.constant 0 : i32
    %c0_i32_0 = arith.constant 0 : i32
    %c0_i32_1 = arith.constant 0 : i32
    return %arg0, %c0_i32, %c0_i32_0 : i32, i32, i32
  }
  func.func @transform_4(%arg0: i32, %arg1: i32) -> (i32, i32, i32) {
    %c0_i32 = arith.constant 0 : i32
    %c0_i32_0 = arith.constant 0 : i32
    %c0_i32_1 = arith.constant 0 : i32
    return %arg0, %c0_i32, %c0_i32_0 : i32, i32, i32
  }
}

</mosaic_0001>

<bundles_post_ra>
// kernel: tpu_custom_call.1
= control target key start
LH: loop header
LB: loop body
LE: loop exit
PB: predicated region body
PF: predicated region fallthrough
CT: control target
= control target key end

     0   :  { %10 = vsyncpa [#allocation3], 0  ;;  %s1500_s0 = inlined_call_operand.hbm [shape: f32[2,4,256], index: 0, kind: input, shape index: {}]   ;;  %s1501_s1 = inlined_call_operand.hbm [shape: s32[2,1,256], index: 1, kind: input, shape index: {}]   ;;  %s1502_s2 = inlined_call_operand.hbm [shape: s32[2,4,512], index: 2, kind: output, shape index: {0}]   ;;  %s1503_s3 = inlined_call_operand.hbm [shape: s32[2,4,512], index: 3, kind: output, shape index: {1}]   ;;  %s1504_s4 = inlined_call_operand.hbm [shape: s32[2,4,512], index: 4, kind: output, shape index: {2}]  }
   0x1   :  { %12 = vsyncpa [#allocation3 + $0x1], 0 }
   0x2   :  { %13 = vsyncpa [#allocation6], 0 }
   0x3   :  { %15 = vsyncpa [#allocation6 + $0x1], 0 }
   0x4   :  { %16 = vsyncpa [#allocation4], 0 }
   0x5   :  { %18 = vsyncpa [#allocation4 + $0x1], 0 }
   0x6   :  { %19 = vsyncpa [#allocation9], 0 }
   0x7   :  { %21 = vsyncpa [#allocation9 + $0x1], 0  ;;  %s1149_s15 = smov 0   ;;  %s1151_s16 = smov 0  }
   0x8   :  { %s1153_s17 = smov 0   ;;  %s1155_s18 = smov 0  }
   0x9   :  { %s1157_s19 = smov 0   ;;  %s1159_s20 = smov 0  }
   0xa LB: > { %s1180_s21 = sadd.s32 4294967295, %s1113_s20   ;;  %s1505_s22 = sadd.s32 4294967294, %s1113_s20   ;;  %s1113_s20 = sphi %s1159_s20, %s27_s20   ;;  %s1109_s19 = sphi %s1157_s19, %s1529_s19   ;;  %s1105_s18 = sphi %s1155_s18, %s1528_s18   ;;  %s1101_s17 = sphi %s1153_s17, %s1527_s17   ;;  %s1097_s16 = sphi %s1151_s16, %s1526_s16   ;;  %s1093_s15 = sphi %s1149_s15, %s1525_s15  }
   0xb   : > { %s39_s23 = sadd.s32 1, %s1109_s19  ;;  %s48_s24 = sadd.s32 1, %s1101_s17 }
   0xc   : > { %p41_p0 = scmp.ge.s32.totalorder %s39_s23, 2  ;;  %p55_p1 = scmp.ne.s32.totalorder %s1101_s17, %s1097_s16 }
   0xd   : > { %p56_p2 = scmp.eq.s32.totalorder %s1113_s20, 0  ;;  %p61_p3 = scmp.ne.s32.totalorder %s1097_s16, %s1093_s15 }
   0xe   : > { %s1531_s23 = smov (%p41_p0, %s39_s23), 0  ;;  %p62_p5 = scmp.eq.s32.totalorder %s1180_s21, 0 }
   0xf   : > { %1509 = sst [smem:[#allocation15_spill]] %s1531_s23  ;;  %p1192_p4 = por %p56_p2, %p55_p1 }
  0x10   : > { %s43_s26 = ssub.s32 %s1109_s19, %s1531_s23  ;;  %p113_p6 = scmp.eq.s32.totalorder %s1180_s21, 1 }
  0x11   : > { %p46_p7 = scmp.eq.s32.totalorder %s43_s26, 0  ;;  %p1200_p8 = por %p62_p5, %p61_p3 }
  0x12   : > { %p1204_p9 = por %p113_p6, %p55_p1  ;;  %p119_p10 = scmp.eq.s32.totalorder %s1505_s22, 1 }
  0x13   : > { %s1211_s29 = scalar_select %p46_p7, %s1101_s17, %s48_s24  }
  0x14   : > { %s1512_s28 = scalar_select %p1204_p9, 1, 0 }
  0x15   : > { %p1213_p11 = por %p119_p10, %p61_p3  ;;  %p1507_p12 = scmp.ge.s32.totalorder %s1113_s20, 2 }
  0x17   : > { %s1513_s30 = scalar_select %p1213_p11, 1, 0 }
  0x18   : > { %187 = sbr.rel (%p1507_p12) target bundleno = 91 (0x5b), region = 16 }
  0x1f   : > { %190 = sbr.rel (!%p1192_p4) target bundleno = 61 (0x3d), region = 20  ;;  %s191_s5 = sand.u32 (%p1192_p4), 1, %s1101_s17  }
  0x20   : > { %s819_s6 = sshll.u32 (%p1192_p4), %s191_s5, 4  ;;  %s1223_s7 = scalar_lea.sflag (%p1192_p4), [#allocation3], %s191_s5 }
  0x21   : > { %s195_s8 = scalar_lea.vmem (%p1192_p4), [#allocation2], %s819_s6 }
  0x26   : > { %201 = vsyncadd %s1223_s7, 128  ;;  %s842_s9 = sshll.u32 %s1109_s19, 7  ;;  %s209_s10 = sshll.u32 %s195_s8, 4  ;;  %s210_s10 = int_to_ptr.vmem [resolvable:$true] %s209_s10 }
  0x27   : > { %s206_s13 = scalar_lea.hbm %s1500_s0, %s842_s9  ;;  %s921_s22 = scalar_lea.hbm %s1500_s0, 256 }
  0x28   : > { %s919_s14 = scalar_lea.hbm %s206_s13, 128  ;;  %p922_p0 = scmp.lt.u32.totalorder %s206_s13, %s1500_s0 }
  0x29   : > { %p920_p13 = scmp.ne.s32.totalorder %s206_s13, %s919_s14  ;;  %p923_p1 = scmp.lt.u32.totalorder %s921_s22, %s919_s14 }
  0x2a   : > { %p925_p3 = scmp.lt.u32.totalorder %s919_s14, %s206_s13 }
  0x2b   : > { %p924_p2 = por %p923_p1, %p922_p0 }
  0x2d   : > { %p926_p5 = por %p925_p3, %p924_p2 }
  0x2f   : > { %p927_p6 = pnand %p926_p5, %p920_p13 }
  0x31   : > { %930 = shalt.err (!%p927_p6)
}
  0x32   : > { %s931_s6 = scalar_lea.vmem %s210_s10, 128  ;;  %s1115_s8 = smov [#allocation2]  }
  0x33   : > { %p932_p7 = scmp.ne.s32.totalorder %s210_s10, %s931_s6  ;;  %s933_s9 = sshll.u32 %s1115_s8, 4  ;;  %s934_s9 = int_to_ptr.vmem [resolvable:$false] %s933_s9 }
  0x34   : > { %s935_s11 = scalar_lea.vmem %s934_s9, 512  ;;  %p936_p10 = scmp.lt.s32.totalorder %s210_s10, %s934_s9 }
  0x35   : > { %p937_p12 = scmp.lt.s32.totalorder %s935_s11, %s931_s6 }
  0x37   : > { %p938_p11 = por %p937_p12, %p936_p10 }
  0x39   : > { %p939_p9 = pnand %p938_p11, %p932_p7 }
  0x3b   : > { %942 = shalt.err (!%p939_p9)
}
  0x3c   : > { %212 = dma.hbm_to_vmem [thread:$0]  %s206_s13, 128, %s210_s10, %s1223_s7  }
  0x3d PF: > { %215 = sbr.rel (!%p1192_p4) target bundleno = 91 (0x5b), region = 24  ;;  %s216_s22 = sand.u32 (%p1192_p4), 1, %s1101_s17  }
  0x3e   : > { %s822_s23 = sshll.u32 (%p1192_p4), %s216_s22, 2  ;;  %s1240_s12 = scalar_lea.sflag (%p1192_p4), [#allocation6], %s216_s22 }
  0x3f   : > { %s220_s14 = scalar_lea.vmem (%p1192_p4), [#allocation5], %s822_s23 }
  0x44   : > { %226 = vsyncadd %s1240_s12, 32  ;;  %s843_s24 = sshll.u32 %s1109_s19, 5  ;;  %s233_s26 = sshll.u32 %s220_s14, 4  ;;  %s234_s26 = int_to_ptr.vmem [resolvable:$true] %s233_s26 }
  0x45   : > { %s231_s8 = scalar_lea.hbm %s1501_s1, %s843_s24  ;;  %s945_s13 = scalar_lea.hbm %s1501_s1, 64 }
  0x46   : > { %s943_s7 = scalar_lea.hbm %s231_s8, 32  ;;  %p946_p4 = scmp.lt.u32.totalorder %s231_s8, %s1501_s1 }
  0x47   : > { %p944_p9 = scmp.ne.s32.totalorder %s231_s8, %s943_s7  ;;  %p947_p11 = scmp.lt.u32.totalorder %s945_s13, %s943_s7 }
  0x48   : > { %p949_p13 = scmp.lt.u32.totalorder %s943_s7, %s231_s8 }
  0x49   : > { %p948_p12 = por %p947_p11, %p946_p4 }
  0x4b   : > { %p950_p0 = por %p949_p13, %p948_p12 }
  0x4d   : > { %p951_p1 = pnand %p950_p0, %p944_p9 }
  0x4f   : > { %954 = shalt.err (!%p951_p1)
}
  0x50   : > { %s955_s22 = scalar_lea.vmem %s234_s26, 32  ;;  %s1116_s23 = smov [#allocation5]  }
  0x51   : > { %p956_p2 = scmp.ne.s32.totalorder %s234_s26, %s955_s22  ;;  %s957_s14 = sshll.u32 %s1116_s23, 4  ;;  %s958_s14 = int_to_ptr.vmem [resolvable:$false] %s957_s14 }
  0x52   : > { %s959_s24 = scalar_lea.vmem %s958_s14, 128  ;;  %p960_p3 = scmp.lt.s32.totalorder %s234_s26, %s958_s14 }
  0x53   : > { %p961_p5 = scmp.lt.s32.totalorder %s959_s24, %s955_s22 }
  0x55   : > { %p962_p6 = por %p961_p5, %p960_p3 }
  0x57   : > { %p963_p7 = pnand %p962_p6, %p956_p2 }
  0x59   : > { %966 = shalt.err (!%p963_p7)
}
  0x5a   : > { %236 = dma.hbm_to_vmem [thread:$0]  %s231_s8, 32, %s234_s26, %s1240_s12  }
  0x5b PF: > { %p825_p10 = scmp.ge.s32.totalorder %s1113_s20, 1  ;;  %p238_p9 = scmp.lt.s32.totalorder %s1113_s20, 3 }
  0x5d   : > { %p239_p4 = pnand %p825_p10, %p238_p9 }
  0x5e   : > { %s1257_s5 = sand.u32 (!%p239_p4), 1, %s1097_s16  }
  0x5f   : > { %242 = sbr.rel (%p239_p4) target bundleno = 202 (0xca), region = 28  ;;  %s1260_s6 = sshll.u32 (!%p239_p4), %s1257_s5, 4 }
  0x60   : > { %s245_s7 = scalar_lea.sflag (!%p239_p4), [#allocation3], %s1257_s5  ;;  %s248_s25 = scalar_lea.vmem (!%p239_p4), [#allocation2], %s1260_s6 }
  0x66   : > { %1076 = dma.done.wait (%p1200_p8), %s245_s7, 256  }
  0x67   : > { %1078 = vsyncadd (%p1200_p8), %s245_s7, 4294967040  ;;  %s827_s12 = sshll.u32 %s1257_s5, 2  ;;  %s254_s26 = scalar_lea.sflag [#allocation6], %s1257_s5 }
  0x68   : > { %s257_s8 = scalar_lea.vmem [#allocation5], %s827_s12 }
  0x69   : > { %1080 = dma.done.wait (%p1200_p8), %s254_s26, 64  }
  0x6a   : > { %1082 = vsyncadd (%p1200_p8), %s254_s26, 4294967232  ;;  %v304_v0 = vlaneseq  ;;  %v1117_v4 = vmov 4   ;;  %vm320_vm0 = vcmask 1043456   ;;  %v313_v6 = vld [vmem:[%s257_s8] sm:$0xf]  ;;  %v1118_v8 = vmov 1  }
  0x6b   : > { %v1281_v7 = vld [vmem:[%s248_s25] sm:$0xff]  ;;  %vm416_vm1 = vcmp.ne.s32.totalorder %v313_v6, 255  ;;  %v1119_v12 = vmov 0   ;;  %v1120_v22 = vmov 839922192   ;;  %s1304_s27 = scalar_lea.vmem [#allocation8], %s1260_s6 }
  0x6c   : > { %v1274_v1 = vshrl.u32 %v304_v0, 7  ;;  %v417_v13 = vsel %vm416_vm1, 1, %v1119_v12  ;;  %v316_v15 = vcombine.high %v1281_v7, %v1281_v7  ;;  %v321_v16 = vsel %vm320_vm0, %v1281_v7, -inf  ;;  %s1310_s10 = scalar_lea.vmem [#allocation10], %s1260_s6  ;;  %s633_s13 = sshll.u32 %s1304_s27, 4  ;;  %s1347_s13 = int_to_ptr.vmem [resolvable:$true] %s633_s13 }
  0x6d   : > { %v322_v20 = vrot.slane %v321_v16, 4  ;;  %v360_v23 = vunpack.c.l.s4 %v1120_v22  ;;  %s599_s9 = sand.u32 1, %s1180_s21   ;;  %s1329_s11 = sshll.u32 %s1105_s18, 8 }
  0x6e   : > { %v1277_v2 = vsub.s32 0, %v1274_v1  ;;  %v424_v3 = vsub.s32 1, %v1274_v1  ;;  %v328_v21 = vsel %vm320_vm0, %v316_v15, -inf  ;;  %s1350_s18 = scalar_lea.vmem [#allocation7], %s1260_s6  ;;  %s1357_s23 = scalar_lea.hbm %s1503_s3, %s1329_s11 }
  0x6f   : > { %v323_v25 = vmax.f32 %v321_v16, %v322_v20  ;;  %v329_v26 = vrot.slane %v328_v21, 4  ;;  %v361_v34 = vunpack.c.0.s8 %v360_v23  ;;  %s1361_s14 = scalar_lea.sflag [#allocation9], %s599_s9  ;;  %s967_s24 = scalar_lea.vmem %s1347_s13, 256 }
  0x70   : > { %v477_v5 = vrot.slane %v1117_v4, %v1277_v2  ;;  %v525_v9 = vrot.slane %v1118_v8, %v1277_v2  ;;  %v445_v10 = vrot.slane %v313_v6, %v1277_v2  ;;  %v449_v11 = vrot.slane %v313_v6, %v424_v3  ;;  %p968_p8 = scmp.ne.s32.totalorder %s1347_s13, %s967_s24  ;;  %p1520_p11 = scmp.ne.s32.totalorder %s1512_s28, 0 }
  0x71   : > { %v421_v17 = vrot.slane %v417_v13, %v1277_v2  ;;  %v1295_v18 = vrot.slane %v417_v13, %v424_v3  ;;  %v324_v32 = vrot.slane %v323_v25, 2  ;;  %v330_v33 = vmax.f32 %v328_v21, %v329_v26  ;;  %s1121_s6 = smov [#allocation8]  }
  0x72   : > { %vm484_vm2 = vcmp.eq.s32.totalorder %v477_v5, %v1274_v1  ;;  %vm532_vm3 = vcmp.eq.s32.totalorder %v525_v9, 1  ;;  %v364_v45 = vsub.s32 %v361_v34, %v1274_v1  ;;  %p969_p12 = pnand %p968_p8, %p1520_p11  ;;  %s971_s7 = sshll.u32 %s1121_s6, 4  ;;  %s972_s7 = int_to_ptr.vmem [resolvable:$false] %s971_s7 }
  0x73   : > { %v544_v14 = vsel %vm484_vm2, 1, %v1119_v12  ;;  %vm1298_vm4 = vcmp.ne.s32.totalorder %v421_v17, 0  ;;  %vm435_vm5 = vcmp.ne.s32.totalorder %v1295_v18, 0  ;;  %vm536_vm6 = vmand %vm484_vm2, %vm532_vm3  ;;  %v325_v38 = vmax.f32 %v323_v25, %v324_v32  ;;  %s973_s25 = scalar_lea.vmem %s972_s7, 512  ;;  %p974_p0 = scmp.lt.s32.totalorder %s1347_s13, %s972_s7 }
  0x74   : > { %v559_v19 = vcombine.low %v544_v14, %v544_v14  ;;  %v1315_v27 = vsel %vm1298_vm4, %v445_v10, 4  ;;  %v1319_v28 = vsel %vm435_vm5, %v449_v11, 4  ;;  %v540_v29 = vsel %vm536_vm6, 1, %v1119_v12  ;;  %p970_p13 = pneg %p969_p12  ;;  %p975_p1 = scmp.lt.s32.totalorder %s973_s25, %s967_s24 }
  0x75   : > { %v469_v30 = vrot.slane %v1315_v27, %v1277_v2  ;;  %v473_v31 = vrot.slane %v1319_v28, %v1277_v2  ;;  %v555_v35 = vcombine.low %v540_v29, %v540_v29  ;;  %v331_v39 = vrot.slane %v330_v33, 2 }
  0x76   : > { %561 = vst [vmem:[%s1304_s27 + $0x8] sm:$0xff] %v559_v19  ;;  %565 = vst [vmem:[%s1310_s10 + $0x8] sm:$0xff] %v559_v19  ;;  %v326_v43 = vrot.slane %v325_v38, 1  ;;  %p976_p2 = por %p975_p1, %p974_p0 }
  0x77   : > { %vm1332_vm7 = vcmp.eq.s32.totalorder %v469_v30, %v1274_v1  ;;  %vm1337_vm8 = vcmp.eq.s32.totalorder %v473_v31, %v1274_v1  ;;  %557 = vst [vmem:[%s1350_s18 + $0x8] sm:$0xff] %v555_v35  ;;  %v332_v44 = vmax.f32 %v330_v33, %v331_v39 }
  0x78   : > { %v542_v40 = vsel %vm1332_vm7, 1, %v1119_v12  ;;  %v543_v41 = vsel %vm1337_vm8, 1, %v1119_v12  ;;  %v327_v46 = vmax.f32 %v325_v38, %v326_v43  ;;  %p977_p3 = pnand %p976_p2, %p970_p13 }
  0x79   : > { %v558_v42 = vcombine.low %v542_v40, %v543_v41  ;;  %v333_v47 = vrot.slane %v332_v44, 1 }
  0x7b   : > { %560 = vst [vmem:[%s1304_s27] sm:$0xff] %v558_v42 }
  0x7c   : > { %980 = shalt.err (!%p977_p3)
}
  0x7d   : > { %s981_s12 = scalar_lea.hbm %s1357_s23, 256  ;;  %s985_s27 = scalar_lea.hbm %s1503_s3, 512 }
  0x7e   : > { %p982_p5 = scmp.ne.s32.totalorder %s1357_s23, %s981_s12  ;;  %p986_p10 = scmp.lt.u32.totalorder %s1357_s23, %s1503_s3 }
  0x7f   : > { %p987_p9 = scmp.lt.u32.totalorder %s985_s27, %s981_s12  ;;  %p989_p8 = scmp.lt.u32.totalorder %s981_s12, %s1357_s23 }
  0x80   : > { %p983_p6 = pnand %p982_p5, %p1520_p11 }
  0x81   : > { %p988_p4 = por %p987_p9, %p986_p10 }
  0x82   : > { %p984_p7 = pneg %p983_p6 }
  0x83   : > { %p990_p12 = por %p989_p8, %p988_p4 }
  0x85   : > { %p991_p13 = pnand %p990_p12, %p984_p7 }
  0x87   : > { %994 = shalt.err (!%p991_p13)
}
  0x88   : > { %850 = dma.vmem_to_hbm [thread:$0]  (%p1520_p11), %s1347_s13, 256, %s1357_s23, %s1361_s14   ;;  %v334_v48 = vmax.f32 %v332_v44, %v333_v47  ;;  %v365_v49 = vrot.slane %v1274_v1, %v364_v45 }
  0x89   : > { %s647_s13 = sshll.u32 %s1310_s10, 4  ;;  %s619_s22 = sshll.u32 %s1350_s18, 4  ;;  %s1410_s13 = int_to_ptr.vmem [resolvable:$true] %s647_s13  ;;  %s1420_s22 = int_to_ptr.vmem [resolvable:$true] %s619_s22 }
  0x8a   : > { %v353_v50 = vcombine.low %v327_v46, %v334_v48  ;;  %s1416_s6 = scalar_lea.hbm %s1504_s4, %s1329_s11  ;;  %s1428_s12 = scalar_lea.hbm %s1502_s2, %s1329_s11 }
  0x8b   : > { %s995_s26 = scalar_lea.vmem %s1410_s13, 256  ;;  %s1122_s8 = smov [#allocation10]  }
  0x8c   : > { %vm357_vm9 = vcmp.eq.f32.partialorder %v1281_v7, %v353_v50  ;;  %p996_p0 = scmp.ne.s32.totalorder %s1410_s13, %s995_s26  ;;  %s999_s27 = sshll.u32 %s1122_s8, 4  ;;  %s1000_s27 = int_to_ptr.vmem [resolvable:$false] %s999_s27 }
  0x8d   : > { %v366_v51 = vsel %vm357_vm9, %v365_v49, 4  ;;  %s1001_s9 = scalar_lea.vmem %s1000_s27, 512  ;;  %p1002_p3 = scmp.lt.s32.totalorder %s1410_s13, %s1000_s27 }
  0x8e   : > { %v368_v52 = vcombine.high %v366_v51, %v366_v51  ;;  %v370_v53 = vsel %vm320_vm0, %v366_v51, 2147483647  ;;  %p997_p1 = pnand %p996_p0, %p1520_p11  ;;  %p1003_p5 = scmp.lt.s32.totalorder %s1001_s9, %s995_s26 }
  0x8f   : > { %v371_v54 = vrot.slane %v370_v53, 4 }
  0x90   : > { %v380_v55 = vsel %vm320_vm0, %v368_v52, 2147483647  ;;  %p998_p2 = pneg %p997_p1  ;;  %p1004_p6 = por %p1003_p5, %p1002_p3 }
  0x91   : > { %vm372_vm10 = vcmp.lt.s32.totalorder %v370_v53, %v371_v54  ;;  %v381_v56 = vrot.slane %v380_v55, 4 }
  0x92   : > { %v373_v57 = vsel %vm372_vm10, %v370_v53, %v371_v54  ;;  %p1005_p7 = pnand %p1004_p6, %p998_p2 }
  0x93   : > { %v374_v58 = vrot.slane %v373_v57, 2  ;;  %vm382_vm11 = vcmp.lt.s32.totalorder %v380_v55, %v381_v56 }
  0x94   : > { %v383_v59 = vsel %vm382_vm11, %v380_v55, %v381_v56 }
  0x95   : > { %vm375_vm12 = vcmp.lt.s32.totalorder %v373_v57, %v374_v58  ;;  %v384_v60 = vrot.slane %v383_v59, 2 }
  0x96   : > { %v376_v61 = vsel %vm375_vm12, %v373_v57, %v374_v58 }
  0x97   : > { %v377_v62 = vrot.slane %v376_v61, 1  ;;  %vm385_vm13 = vcmp.lt.s32.totalorder %v383_v59, %v384_v60 }
  0x98   : > { %v386_v63 = vsel %vm385_vm13, %v383_v59, %v384_v60 }
  0x99   : > { %vm378_vm14 = vcmp.lt.s32.totalorder %v376_v61, %v377_v62  ;;  %v387_v0 = vrot.slane %v386_v63, 1 }
  0x9a   : > { %v379_v3 = vsel %vm378_vm14, %v376_v61, %v377_v62 }
  0x9b   : > { %vm388_vm15 = vcmp.lt.s32.totalorder %v386_v63, %v387_v0  ;;  %v462_v4 = vsel %vm1298_vm4, %v379_v3, 4 }
  0x9c   : > { %v389_v5 = vsel %vm388_vm15, %v386_v63, %v387_v0  ;;  %vm506_vm0 = vcmp.eq.s32.totalorder %v462_v4, %v1315_v27  ;;  %v489_v6 = vrot.slane %v462_v4, %v1277_v2 }
  0x9d   : > { %v463_v7 = vsel %vm435_vm5, %v389_v5, 4  ;;  %v510_v8 = vsel %vm506_vm0, 1, %v1119_v12 }
  0x9e   : > { %vm507_vm1 = vcmp.eq.s32.totalorder %v463_v7, %v1319_v28  ;;  %v517_v9 = vrot.slane %v510_v8, %v1277_v2  ;;  %v493_v10 = vrot.slane %v463_v7, %v1277_v2  ;;  %vm502_vm2 = vcmp.eq.s32.totalorder %v489_v6, %v1274_v1 }
  0x9f   : > { %v511_v11 = vsel %vm507_vm1, 1, %v1119_v12  ;;  %v546_v13 = vsel %vm502_vm2, 1, %v1119_v12 }
  0xa0   : > { %v521_v14 = vrot.slane %v511_v11, %v1277_v2  ;;  %vm530_vm3 = vcmp.eq.s32.totalorder %v517_v9, 1  ;;  %vm503_vm4 = vcmp.eq.s32.totalorder %v493_v10, %v1274_v1 }
  0xa1   : > { %vm534_vm5 = vmand %vm1332_vm7, %vm530_vm3  ;;  %v547_v15 = vsel %vm503_vm4, 1, %v1119_v12 }
  0xa2   : > { %vm531_vm6 = vcmp.eq.s32.totalorder %v521_v14, 1  ;;  %v538_v16 = vsel %vm534_vm5, 1, %v1119_v12  ;;  %v562_v17 = vcombine.low %v546_v13, %v547_v15 }
  0xa3   : > { %vm535_vm9 = vmand %vm1337_vm8, %vm531_vm6 }
  0xa4   : > { %v539_v1 = vsel %vm535_vm9, 1, %v1119_v12  ;;  %564 = vst [vmem:[%s1310_s10] sm:$0xff] %v562_v17 }
  0xa5   : > { %v554_v2 = vcombine.low %v538_v16, %v539_v1 }
  0xa6   : > { %1008 = shalt.err (!%p1005_p7)
}
  0xa7   : > { %s1009_s10 = scalar_lea.hbm %s1416_s6, 256  ;;  %s1013_s23 = scalar_lea.hbm %s1504_s4, 512 }
  0xa8   : > { %p1010_p10 = scmp.ne.s32.totalorder %s1416_s6, %s1009_s10  ;;  %p1014_p8 = scmp.lt.u32.totalorder %s1416_s6, %s1504_s4 }
  0xa9   : > { %p1015_p12 = scmp.lt.u32.totalorder %s1013_s23, %s1009_s10  ;;  %p1017_p0 = scmp.lt.u32.totalorder %s1009_s10, %s1416_s6 }
  0xaa   : > { %p1011_p9 = pnand %p1010_p10, %p1520_p11 }
  0xab   : > { %p1016_p13 = por %p1015_p12, %p1014_p8 }
  0xac   : > { %p1012_p4 = pneg %p1011_p9 }
  0xad   : > { %p1018_p1 = por %p1017_p0, %p1016_p13 }
  0xaf   : > { %p1019_p2 = pnand %p1018_p1, %p1012_p4 }
  0xb1   : > { %1022 = shalt.err (!%p1019_p2)
}
  0xb2   : > { %851 = dma.vmem_to_hbm [thread:$0]  (%p1520_p11), %s1410_s13, 256, %s1416_s6, %s1361_s14   ;;  %556 = vst [vmem:[%s1350_s18] sm:$0xff] %v554_v2 }
  0xb3   : > { %s595_s25 = scalar_lea.sflag [#allocation4], %s1257_s5  ;;  %s1023_s26 = scalar_lea.vmem %s1420_s22, 256 }
  0xb4   : > { %p1024_p3 = scmp.ne.s32.totalorder %s1420_s22, %s1023_s26  ;;  %s1123_s8 = smov [#allocation7]  }
  0xb5   : > { %s1027_s27 = sshll.u32 %s1123_s8, 4  ;;  %s1028_s27 = int_to_ptr.vmem [resolvable:$false] %s1027_s27 }
  0xb6   : > { %p1025_p5 = pnand %p1024_p3, %p1520_p11  ;;  %s1029_s9 = scalar_lea.vmem %s1028_s27, 512 }
  0xb7   : > { %p1030_p7 = scmp.lt.s32.totalorder %s1420_s22, %s1028_s27  ;;  %p1031_p10 = scmp.lt.s32.totalorder %s1029_s9, %s1023_s26 }
  0xb8   : > { %p1026_p6 = pneg %p1025_p5 }
  0xb9   : > { %p1032_p9 = por %p1031_p10, %p1030_p7 }
  0xbb   : > { %p1033_p4 = pnand %p1032_p9, %p1026_p6 }
  0xbd   : > { %1036 = shalt.err (!%p1033_p4)
}
  0xbe   : > { %s1037_s5 = scalar_lea.hbm %s1428_s12, 256  ;;  %s1041_s13 = scalar_lea.hbm %s1502_s2, 512 }
  0xbf   : > { %p1038_p8 = scmp.ne.s32.totalorder %s1428_s12, %s1037_s5  ;;  %p1042_p0 = scmp.lt.u32.totalorder %s1428_s12, %s1502_s2 }
  0xc0   : > { %p1043_p1 = scmp.lt.u32.totalorder %s1041_s13, %s1037_s5  ;;  %p1045_p3 = scmp.lt.u32.totalorder %s1037_s5, %s1428_s12 }
  0xc1   : > { %p1039_p12 = pnand %p1038_p8, %p1520_p11 }
  0xc2   : > { %p1044_p2 = por %p1043_p1, %p1042_p0 }
  0xc3   : > { %p1040_p13 = pneg %p1039_p12 }
  0xc4   : > { %p1046_p5 = por %p1045_p3, %p1044_p2 }
  0xc6   : > { %p1047_p6 = pnand %p1046_p5, %p1040_p13 }
  0xc8   : > { %1050 = shalt.err (!%p1047_p6)
}
  0xc9   : > { %849 = dma.vmem_to_hbm [thread:$0]  (%p1520_p11), %s1420_s22, 256, %s1428_s12, %s595_s25  }
  0xca PF: > { %s659_s11 = sand.u32 1, %s1093_s15   ;;  %p1521_p7 = scmp.ne.s32.totalorder %s1513_s30, 0 }
  0xcb   : > { %p1522_p10 = scmp.ge.s32.totalorder %s1113_s20, 2  ;;  %s660_s21 = scalar_lea.sflag [#allocation4], %s659_s11 }
  0xcd   : > { %p856_p9 = pnand %p1522_p10, %p1521_p7 }
  0xcf   : > { %1084 = dma.done.wait (!%p856_p9), %s660_s21, 256  }
  0xd0   : > { %1086 = vsyncadd (!%p856_p9), %s660_s21, 4294967040  ;;  %s1523_s23 = sadd.s32 4294967294, %s1113_s20  }
  0xd1   : > { %s668_s24 = sand.u32 1, %s1523_s23  }
  0xd2   : > { %s669_s7 = scalar_lea.sflag [#allocation9], %s668_s24 }
  0xd3   : > { %1088 = dma.done.wait (!%p856_p9), %s669_s7, 512  }
  0xd4   : > { %1090 = vsyncadd (!%p856_p9), %s669_s7, 4294966784  ;;  %s27_s20 = sadd.s32 1, %s1113_s20   ;;  %s1524_s28 = sld [smem:[#allocation15_spill]] }
  0xd5   : > { %p24_p11 = scmp.ge.s32.totalorder %s27_s20, 4   ;;  %s1525_s15 = smov %s1097_s16 }
  0xd6   : > { %s1526_s16 = smov %s1101_s17  ;;  %s1527_s17 = smov %s1211_s29 }
  0xd7   : > { %s1528_s18 = smov %s1109_s19  ;;  %26 = sbr.rel (!%p24_p11) target bundleno = 10 (0xa), region = 126 }
  0xda   : > { %s1529_s19 = smov %s1524_s28 }
  0xde   :  { %683 = vsyncpa [#allocation3], 1 }
  0xdf   :  { %685 = vsyncpa [#allocation3 + $0x1], 1 }
  0xe0   :  { %686 = vsyncpa [#allocation6], 1 }
  0xe1   :  { %688 = vsyncpa [#allocation6 + $0x1], 1 }
  0xe2   :  { %689 = vsyncpa [#allocation4], 1 }
  0xe3   :  { %691 = vsyncpa [#allocation4 + $0x1], 1 }
  0xe4   :  { %692 = vsyncpa [#allocation9], 1 }
  0xe5   :  { %694 = vsyncpa [#allocation9 + $0x1], 1 }

</bundles_post_ra>
